<compile_context>
chip_gen: v7x
topology: tpu7x:2x2x1
jax: 0.10.0
libtpu: 0.0.40
codegen_flags: <defaults>
</compile_context>

<pallas_src>
import math

import jax
import jax.numpy as jnp
from jax.experimental import pallas as pl
from jax.experimental.pallas import tpu as pltpu


# ---------------------------------------------------------------------------
# Per-generation budgets
# ---------------------------------------------------------------------------
def _chip_budgets():
    """Return (vmem_limit_bytes, per-output-block byte budget) for this TPU."""
    vmem_bytes = 128 * 1024 * 1024
    try:
        info = pltpu.get_tpu_info()
        vmem_bytes = int(getattr(info, "vmem_capacity_bytes", vmem_bytes))
    except Exception:
        pass
    if vmem_bytes <= 64 * 1024 * 1024:            # v7x: 64 MiB / TensorCore
        return 44 * 1024 * 1024, 5 * 1024 * 1024
    return 96 * 1024 * 1024, 12 * 1024 * 1024     # v5e / v6e: 128 MiB


# ---------------------------------------------------------------------------
# In-kernel helpers
# ---------------------------------------------------------------------------
def _attention_gate(text, w1, b1, w2, b2):
    """gated = text * softmax(Linear(ReLU(Linear(text))), axis=-1), f32 result.

    Weights arrive in bf16 (cast once in the wrapper) -> native MXU rate; biases and
    the softmax run in f32."""
    t = text.astype(w1.dtype)
    h = jnp.maximum(
        jnp.dot(t, w1, preferred_element_type=jnp.float32) + b1, 0.0)
    logits = jnp.dot(h.astype(w2.dtype), w2,
                     preferred_element_type=jnp.float32) + b2
    m = jnp.max(logits, axis=-1, keepdims=True)
    e = jnp.exp(logits - m)
    # One reciprocal per row: full precision keeps parity with the PyTorch softmax.
    attn = e * pl.reciprocal(jnp.sum(e, axis=-1, keepdims=True), approx=False)
    return text.astype(jnp.float32) * attn


# ---------------------------------------------------------------------------
# Kernels
# ---------------------------------------------------------------------------
def _addition_same_kernel(ab_ref, img_ref, text_ref,
                          w1_ref, b1_ref, w2_ref, b2_ref, out_ref):
    """cell_id in {0, 3}: out = alpha * img + beta * (text * attn), (tm, D) tile."""
    gated = _attention_gate(text_ref[...], w1_ref[...], b1_ref[...],
                            w2_ref[...], b2_ref[...])
    out = ab_ref[0] * img_ref[...].astype(jnp.float32) + ab_ref[1] * gated
    out_ref[...] = out.astype(out_ref.dtype)


def _gate_kernel(text_ref, w1_ref, b1_ref, w2_ref, b2_ref, gated_ref):
    """gated = text * attn(text); the MLP runs once per row-tile (hoisted out of O(bs^2))."""
    gated = _attention_gate(text_ref[...], w1_ref[...], b1_ref[...],
                            w2_ref[...], b2_ref[...])
    gated_ref[...] = gated.astype(gated_ref.dtype)


def _broadcast3d_kernel(ab_ref, img_ref, gated_ref, out_ref):
    """D % 128 == 0 path: out[i, j, :] = alpha * img[j, :] + beta * gated[i, :].

    img_ref: (tj, D), gated_ref: (ti, D) [resident across inner j], out_ref: (ti, tj, D)."""
    img = img_ref[...].astype(jnp.float32)
    g = gated_ref[...].astype(jnp.float32)
    out = ab_ref[0] * img[None, :, :] + ab_ref[1] * g[:, None, :]
    out_ref[...] = out.astype(out_ref.dtype)


def _broadcast_flat_kernel(ab_ref, img_flat_ref, gated_rep_ref, out_ref):
    """Fallback lane-dense path: out_flat[i, j*D + d] = alpha*img[j, d] + beta*gated[i, d].

    img_flat_ref is the full (1, bs*D) row, VMEM-resident; sliced in-kernel."""
    lane = out_ref.shape[1]
    if lane == img_flat_ref.shape[1]:
        img = img_flat_ref[...]                                   # single j block
    else:
        start = pl.multiple_of(pl.program_id(1) * lane, 128)      # lane % 128 == 0 (validated)
        img = img_flat_ref[:, pl.ds(start, lane)]
    out = (ab_ref[0] * img.astype(jnp.float32)
           + ab_ref[1] * gated_rep_ref[...].astype(jnp.float32))
    out_ref[...] = out.astype(out_ref.dtype)


# ---------------------------------------------------------------------------
# Tile selection
# ---------------------------------------------------------------------------
def _pick_tile(n, max_tile):
    """Largest multiple of 8 that divides n and is <= max_tile (fallback: n)."""
    t = min(n, max_tile)
    t -= t % 8
    while t >= 8:
        if n % t == 0:
            return t
        t -= 8
    return n


def _pick_col_tile(bs, embed_dim, row_tile, itemsize, budget_bytes):
    """Pick tj so tj*D is a multiple of 128, tj divides bs and the (row_tile, tj*D)
    output block stays under the per-buffer budget."""
    q = 128 // math.gcd(embed_dim, 128)
    if bs % q != 0:
        return bs  # degenerate combination: full extent (stores become lane-masked)
    max_tj = max(q, budget_bytes // max(1, row_tile * embed_dim * itemsize))
    t = (min(bs, max_tj) // q) * q
    while t >= q:
        if bs % t == 0:
            return t
        t -= q
    return bs


def _ensure_multicore(bs, ti, tj):
    """If the grid is a single block, split the i axis so both v7x TCs get work."""
    if bs // ti == 1 and bs // tj == 1 and bs >= 16:
        smaller = _pick_tile(bs, ti // 2)
        if smaller < ti:
            return smaller
    return ti


# ---------------------------------------------------------------------------
# Forward wrapper
# ---------------------------------------------------------------------------
def addition_forward(params, img_emb, text_emb, cell_id, *,
                     out_dtype=None, row_tile=None, col_tile=None):
    """Forward pass of `Addition`. `cell_id` is a static Python int (Python-level branch
    in the PyTorch module). Pass out_dtype=jnp.bfloat16 to halve the dominant HBM
    writeback of the (bs, bs, D) branch when the consumer tolerates it."""
    bs, D = text_emb.shape
    assert img_emb.shape == (bs, D)
    if out_dtype is None:
        out_dtype = jnp.result_type(img_emb.dtype, text_emb.dtype)
    out_itemsize = jnp.dtype(out_dtype).itemsize

    vmem_limit, block_budget = _chip_budgets()

    # alpha/beta ride together as a single tiny SMEM operand.
    ab = jnp.concatenate([jnp.ravel(params["alpha"]),
                          jnp.ravel(params["beta"])]).astype(jnp.float32)
    # bf16 weights: native MXU rate + half the weight VMEM / DMA. Biases stay f32.
    w1 = params["w1"].astype(jnp.bfloat16)
    w2 = params["w2"].astype(jnp.bfloat16)
    b1 = params["b1"].reshape(1, D).astype(jnp.float32)
    b2 = params["b2"].reshape(1, D).astype(jnp.float32)

    smem_spec = pl.BlockSpec(memory_space=pltpu.MemorySpace.SMEM)
    # MLP weights are VMEM-resident (constant index_map) -> single-buffer them.
    w_specs = [
        pl.BlockSpec((D, D), lambda m: (0, 0), pipeline_mode=pl.Buffered(1)),   # w1
        pl.BlockSpec((1, D), lambda m: (0, 0), pipeline_mode=pl.Buffered(1)),   # b1
        pl.BlockSpec((D, D), lambda m: (0, 0), pipeline_mode=pl.Buffered(1)),   # w2
        pl.BlockSpec((1, D), lambda m: (0, 0), pipeline_mode=pl.Buffered(1)),   # b2
    ]
    mlp_cparams = pltpu.CompilerParams(
        dimension_semantics=("parallel",), vmem_limit_bytes=vmem_limit)

    # Row tile for the MLP kernels: as big as the block budget allows (<= 512 rows).
    if row_tile is not None:
        tm = row_tile
    else:
        tm = _pick_tile(bs, min(512, max(8, block_budget // max(1, D * 4))))
    if bs % tm != 0 or (tm % 8 != 0 and tm != bs):
        raise ValueError(f"row_tile={tm} incompatible with batch={bs}")

    if cell_id == 0 or cell_id == 3:
        # ----- same-shape branch: (bs, D), row-tiled -----------------------
        return pl.pallas_call(
            _addition_same_kernel,
            out_shape=jax.ShapeDtypeStruct((bs, D), out_dtype),
            grid=(bs // tm,),
            in_specs=[smem_spec,
                      pl.BlockSpec((tm, D), lambda m: (m, 0)),   # img
                      pl.BlockSpec((tm, D), lambda m: (m, 0)),   # text
                      ] + w_specs,
            out_specs=pl.BlockSpec((tm, D), lambda m: (m, 0)),
            compiler_params=mlp_cparams,
        )(ab, img_emb, text_emb, w1, b1, w2, b2)

    # ----- broadcast branch: out[i, j, :] = alpha*img[j] + beta*gated[i] ----
    # 1) Attention-gate MLP, hoisted into its own small row-tiled kernel so the
    #    two DxD matmuls + softmax run O(bs) times, not once per (i, j) tile.
    #    gated is written in the combine's dtype (halves its HBM read when bf16).
    gated = pl.pallas_call(
        _gate_kernel,
        out_shape=jax.ShapeDtypeStruct((bs, D), out_dtype),
        grid=(bs // tm,),
        in_specs=[pl.BlockSpec((tm, D), lambda m: (m, 0))] + w_specs,
        out_specs=pl.BlockSpec((tm, D), lambda m: (m, 0)),
        compiler_params=mlp_cparams,
    )(text_emb, w1, b1, w2, b2)

    # Cost hint: the bs^2*D writeback dominates everything.
    cost = pl.CostEstimate(
        flops=3 * bs * bs * D,
        transcendentals=0,
        bytes_accessed=(bs * bs * D * out_itemsize
                        + bs * D * (jnp.dtype(img_emb.dtype).itemsize + out_itemsize)))
    combine_cparams = pltpu.CompilerParams(
        dimension_semantics=("parallel", "parallel"),
        vmem_limit_bytes=vmem_limit)

    if D % 128 == 0:
        # 2a) Direct 3-D combine: blocks (ti, tj, D); D is the lane axis (unmasked vst).
        if col_tile is not None:
            tj = col_tile
        else:
            tj = _pick_tile(bs, max(8, block_budget // max(1, 8 * D * out_itemsize)))
        if row_tile is not None:
            ti = row_tile
        else:
            ti = _pick_tile(bs, max(8, block_budget // max(1, tj * D * out_itemsize)))
            ti = _ensure_multicore(bs, ti, tj)
        if bs % ti != 0 or (ti % 8 != 0 and ti != bs):
            raise ValueError(f"row_tile={ti} incompatible with batch={bs}")
        if bs % tj != 0 or (tj % 8 != 0 and tj != bs):
            raise ValueError(f"col_tile={tj} incompatible with batch={bs}")
        n_i, n_j = bs // ti, bs // tj

        return pl.pallas_call(
            _broadcast3d_kernel,
            out_shape=jax.ShapeDtypeStruct((bs, bs, D), out_dtype),
            grid=(n_i, n_j),   # j innermost: gated block stays resident per i-tile
            in_specs=[
                smem_spec,
                pl.BlockSpec((tj, D), lambda i, j: (j, 0)),    # img
                pl.BlockSpec((ti, D), lambda i, j: (i, 0)),    # gated (resident over j)
            ],
            out_specs=pl.BlockSpec((ti, tj, D), lambda i, j: (i, j, 0)),
            compiler_params=combine_cparams,
            cost_estimate=cost,
        )(ab, img_emb, gated)

    # 2b) Fallback: lane-dense flattened (bs, bs*D) output, img fully VMEM-resident.
    ti = row_tile if row_tile is not None else _pick_tile(bs, 128)
    if bs % ti != 0 or (ti % 8 != 0 and ti != bs):
        raise ValueError(f"row_tile={ti} incompatible with batch={bs}")
    tj = (col_tile if col_tile is not None
          else _pick_col_tile(bs, D, ti, out_itemsize, block_budget))
    if bs % tj != 0:
        raise ValueError(f"col_tile={tj} incompatible with batch={bs}")
    if tj != bs and (tj * D) % 128 != 0:
        raise ValueError(f"col_tile={tj} must keep tj*D a multiple of 128 (D={D})")
    ti = _ensure_multicore(bs, ti, tj) if row_tile is None else ti
    lane = tj * D
    n_i, n_j = bs // ti, bs // tj

    # img flattened to one lane-dense row (free reshape) and kept VMEM-resident by the
    # kernel; gated replicated tj times along lanes once in XLA (bs*tj*D -- tiny) so the
    # kernel body is a pure broadcast multiply-add with no in-kernel reshape.
    img_flat = img_emb.reshape(1, bs * D)
    gated_rep = jnp.tile(gated, (1, tj))

    out_flat = pl.pallas_call(
        _broadcast_flat_kernel,
        out_shape=jax.ShapeDtypeStruct((bs, bs * D), out_dtype),
        grid=(n_i, n_j),   # j innermost: gated_rep block stays resident per i-tile
        in_specs=[
            smem_spec,
            pl.BlockSpec((1, bs * D), lambda i, j: (0, 0),
                         pipeline_mode=pl.Buffered(1)),          # img: fully resident
            pl.BlockSpec((ti, lane), lambda i, j: (i, 0)),       # gated_rep
        ],
        out_specs=pl.BlockSpec((ti, lane), lambda i, j: (i, j)),
        compiler_params=combine_cparams,
        cost_estimate=cost,
    )(ab, img_flat, gated_rep)

    return out_flat.reshape(bs, bs, D)


# ---------------------------------------------------------------------------
# Parameter init (matches nn.Linear(embed_dim, embed_dim) x2 + alpha/beta params)
# ---------------------------------------------------------------------------
def init_params(key, embed_dim):
    k1, k2, k3, k4 = jax.random.split(key, 4)
    bound = 1.0 / (embed_dim ** 0.5)
    return {
        "w1": jax.random.uniform(k1, (embed_dim, embed_dim), jnp.float32, -bound, bound),
        "b1": jax.random.uniform(k2, (1, embed_dim), jnp.float32, -bound, bound),
        "w2": jax.random.uniform(k3, (embed_dim, embed_dim), jnp.float32, -bound, bound),
        "b2": jax.random.uniform(k4, (1, embed_dim), jnp.float32, -bound, bound),
        "alpha": jnp.array([1.0], jnp.float32),   # torch.nn.Parameter([1.0])
        "beta": jnp.array([0.0], jnp.float32),    # torch.nn.Parameter([0.0])
    }


def _reference(params, img_emb, text_emb, cell_id):
    """Plain-XLA f32 reference for validation."""
    h = jnp.maximum(text_emb @ params["w1"] + params["b1"].reshape(1, -1), 0.0)
    logits = h @ params["w2"] + params["b2"].reshape(1, -1)
    attn = jax.nn.softmax(logits, axis=-1)          # Softmax(dim=1) on (bs, D)
    gated = text_emb * attn
    a = params["alpha"].reshape(())
    b = params["beta"].reshape(())
    if cell_id != 0 and cell_id != 3:
        return a * img_emb[None, :, :] + b * gated[:, None, :]
    return a * img_emb + b * gated


if __name__ == "__main__":
    bs = 16
    key = jax.random.PRNGKey(0)

    def run_case(embed_dim, cell_id):
        kp, ki, kt = jax.random.split(jax.random.fold_in(key, embed_dim), 3)
        params = init_params(kp, embed_dim)
        # Non-trivial mixing weights so both paths are exercised
        # (PyTorch init alpha=1, beta=0 zeroes the gated-text contribution).
        params["alpha"] = jnp.array([0.75], jnp.float32)
        params["beta"] = jnp.array([0.25], jnp.float32)
        img = jax.random.normal(ki, (bs, embed_dim), jnp.float32)
        txt = jax.random.normal(kt, (bs, embed_dim), jnp.float32)

        out = addition_forward(params, img, txt, cell_id)
        jax.block_until_ready(out)
        ref = _reference(params, img, txt, cell_id)
        assert out.shape == ref.shape, (out.shape, ref.shape)
        assert jnp.allclose(out, ref, rtol=2e-2, atol=2e-2), \
            f"mismatch: D={embed_dim}, cell_id={cell_id}"
        return out

    # Branch 1: cell_id in {0, 3} -> same-shape (bs, D) combine.
    run_case(128, cell_id=0)
    # Branch 2: cell_id not in {0, 3}, D % 128 == 0 -> direct 3-D lane-dense combine.
    run_case(128, cell_id=1)
    # Branch 2 with D not a multiple of 128 -> flattened lane-dense fallback path.
    run_case(32, cell_id=2)

    print("KERNEL_OK")
</pallas_src>

<mosaic_0001>
module attributes {stable_mosaic.version = 11 : i64} {
  func.func @_addition_same_kernel(%arg0: i32, %arg1: memref<2xf32, #tpu.memory_space<smem>>, %arg2: memref<16x128xf32, #tpu.memory_space<vmem>>, %arg3: memref<16x128xf32, #tpu.memory_space<vmem>>, %arg4: memref<128x128xbf16, #tpu.memory_space<vmem>>, %arg5: memref<1x128xf32, #tpu.memory_space<vmem>>, %arg6: memref<128x128xbf16, #tpu.memory_space<vmem>>, %arg7: memref<1x128xf32, #tpu.memory_space<vmem>>, %arg8: memref<16x128xf32, #tpu.memory_space<vmem>>) attributes {dimension_semantics = [#tpu.dimension_semantics<parallel>], iteration_bounds = array<i64: 1>, scalar_prefetch = 0 : i64, scratch_operands = 0 : i64, tpu.core_type = #tpu.core_type<tc>, window_params = [{transform_indices = @transform_0, window_bounds = array<i64: 2>}, {transform_indices = @transform_1, window_bounds = array<i64: 16, 128>}, {transform_indices = @transform_2, window_bounds = array<i64: 16, 128>}, {pipeline_mode = #tpu.pipeline_mode<synchronous>, transform_indices = @transform_3, window_bounds = array<i64: 128, 128>}, {pipeline_mode = #tpu.pipeline_mode<synchronous>, transform_indices = @transform_4, window_bounds = array<i64: 1, 128>}, {pipeline_mode = #tpu.pipeline_mode<synchronous>, transform_indices = @transform_5, window_bounds = array<i64: 128, 128>}, {pipeline_mode = #tpu.pipeline_mode<synchronous>, transform_indices = @transform_6, window_bounds = array<i64: 1, 128>}, {transform_indices = @transform_7, window_bounds = array<i64: 16, 128>}]} {
    %c0 = arith.constant 0 : index
    %c0_0 = arith.constant 0 : index
    %0 = vector.load %arg3[%c0, %c0_0] : memref<16x128xf32, #tpu.memory_space<vmem>>, vector<16x128xf32>
    %c0_1 = arith.constant 0 : index
    %c0_2 = arith.constant 0 : index
    %1 = vector.load %arg4[%c0_1, %c0_2] : memref<128x128xbf16, #tpu.memory_space<vmem>>, vector<128x128xbf16>
    %c0_3 = arith.constant 0 : index
    %c0_4 = arith.constant 0 : index
    %2 = vector.load %arg5[%c0_3, %c0_4] : memref<1x128xf32, #tpu.memory_space<vmem>>, vector<1x128xf32>
    %c0_5 = arith.constant 0 : index
    %c0_6 = arith.constant 0 : index
    %3 = vector.load %arg6[%c0_5, %c0_6] : memref<128x128xbf16, #tpu.memory_space<vmem>>, vector<128x128xbf16>
    %c0_7 = arith.constant 0 : index
    %c0_8 = arith.constant 0 : index
    %4 = vector.load %arg7[%c0_7, %c0_8] : memref<1x128xf32, #tpu.memory_space<vmem>>, vector<1x128xf32>
    %5 = arith.truncf %0 : vector<16x128xf32> to vector<16x128xbf16>
    %cst = arith.constant dense<0.000000e+00> : vector<16x128xf32>
    %6 = tpu.matmul %5, %1, %cst {dimension_numbers = #tpu.dot_dimension_numbers<[1], [0], [0], [1], [0, 0, 1, 1], [], []>} : vector<16x128xbf16>, vector<128x128xbf16>, vector<16x128xf32> -> vector<16x128xf32>
    %7 = vector.broadcast %2 : vector<1x128xf32> to vector<16x128xf32>
    %8 = arith.addf %6, %7 : vector<16x128xf32>
    %cst_9 = arith.constant 0.000000e+00 : f32
    %9 = vector.broadcast %cst_9 : f32 to vector<16x128xf32>
    %10 = arith.maximumf %8, %9 : vector<16x128xf32>
    %11 = arith.truncf %10 : vector<16x128xf32> to vector<16x128xbf16>
    %cst_10 = arith.constant dense<0.000000e+00> : vector<16x128xf32>
    %12 = tpu.matmul %11, %3, %cst_10 {dimension_numbers = #tpu.dot_dimension_numbers<[1], [0], [0], [1], [0, 0, 1, 1], [], []>} : vector<16x128xbf16>, vector<128x128xbf16>, vector<16x128xf32> -> vector<16x128xf32>
    %13 = vector.broadcast %4 : vector<1x128xf32> to vector<16x128xf32>
    %14 = arith.addf %12, %13 : vector<16x128xf32>
    %cst_11 = arith.constant dense<0xFF800000> : vector<16xf32>
    %15 = vector.multi_reduction <maximumf>, %14, %cst_11 [1] : vector<16x128xf32> to vector<16xf32>
    %16 = vector.shape_cast %15 : vector<16xf32> to vector<16x1xf32>
    %17 = vector.broadcast %16 : vector<16x1xf32> to vector<16x128xf32>
    %18 = arith.subf %14, %17 : vector<16x128xf32>
    %19 = math.exp %18 : vector<16x128xf32>
    %cst_12 = arith.constant dense<0.000000e+00> : vector<16xf32>
    %20 = vector.multi_reduction <add>, %19, %cst_12 [1] : vector<16x128xf32> to vector<16xf32>
    %21 = vector.shape_cast %20 : vector<16xf32> to vector<16x1xf32>
    %22 = tpu.reciprocal %21 : vector<16x1xf32> -> vector<16x1xf32>
    %23 = vector.broadcast %22 : vector<16x1xf32> to vector<16x128xf32>
    %24 = arith.mulf %19, %23 : vector<16x128xf32>
    %25 = arith.mulf %0, %24 : vector<16x128xf32>
    %c0_13 = arith.constant 0 : index
    %26 = memref.load %arg1[%c0_13] : memref<2xf32, #tpu.memory_space<smem>>
    %c0_14 = arith.constant 0 : index
    %c0_15 = arith.constant 0 : index
    %27 = vector.load %arg2[%c0_14, %c0_15] : memref<16x128xf32, #tpu.memory_space<vmem>>, vector<16x128xf32>
    %28 = vector.broadcast %26 : f32 to vector<16x128xf32>
    %29 = arith.mulf %28, %27 : vector<16x128xf32>
    %c1 = arith.constant 1 : index
    %30 = memref.load %arg1[%c1] : memref<2xf32, #tpu.memory_space<smem>>
    %31 = vector.broadcast %30 : f32 to vector<16x128xf32>
    %32 = arith.mulf %31, %25 : vector<16x128xf32>
    %33 = arith.addf %29, %32 : vector<16x128xf32>
    %c0_16 = arith.constant 0 : index
    %c0_17 = arith.constant 0 : index
    %34 = vector.load %arg8[%c0_16, %c0_17] : memref<16x128xf32, #tpu.memory_space<vmem>>, vector<16x128xf32>
    tpu.vector_store %arg8[%c0_16, %c0_17], %33 {strides = array<i32>} : memref<16x128xf32, #tpu.memory_space<vmem>>, vector<16x128xf32>,
    return
  }
  func.func @transform_0(%arg0: i32) -> i32 {
    %c0_i32 = arith.constant 0 : i32
    %c0_i32_0 = arith.constant 0 : i32
    return %c0_i32 : i32
  }
  func.func @transform_1(%arg0: i32) -> (i32, i32) {
    %c0_i32 = arith.constant 0 : i32
    %c0_i32_0 = arith.constant 0 : i32
    return %arg0, %c0_i32 : i32, i32
  }
  func.func @transform_2(%arg0: i32) -> (i32, i32) {
    %c0_i32 = arith.constant 0 : i32
    %c0_i32_0 = arith.constant 0 : i32
    return %arg0, %c0_i32 : i32, i32
  }
  func.func @transform_3(%arg0: i32) -> (i32, i32) {
    %c0_i32 = arith.constant 0 : i32
    %c0_i32_0 = arith.constant 0 : i32
    %c0_i32_1 = arith.constant 0 : i32
    return %c0_i32, %c0_i32_0 : i32, i32
  }
  func.func @transform_4(%arg0: i32) -> (i32, i32) {
    %c0_i32 = arith.constant 0 : i32
    %c0_i32_0 = arith.constant 0 : i32
    %c0_i32_1 = arith.constant 0 : i32
    return %c0_i32, %c0_i32_0 : i32, i32
  }
  func.func @transform_5(%arg0: i32) -> (i32, i32) {
    %c0_i32 = arith.constant 0 : i32
    %c0_i32_0 = arith.constant 0 : i32
    %c0_i32_1 = arith.constant 0 : i32
    return %c0_i32, %c0_i32_0 : i32, i32
  }
  func.func @transform_6(%arg0: i32) -> (i32, i32) {
    %c0_i32 = arith.constant 0 : i32
    %c0_i32_0 = arith.constant 0 : i32
    %c0_i32_1 = arith.constant 0 : i32
    return %c0_i32, %c0_i32_0 : i32, i32
  }
  func.func @transform_7(%arg0: i32) -> (i32, i32) {
    %c0_i32 = arith.constant 0 : i32
    %c0_i32_0 = arith.constant 0 : i32
    return %arg0, %c0_i32 : i32, i32
  }
}

</mosaic_0001>

<bundles_post_ra>
// kernel: tpu_custom_call.1
= control target key start
LH: loop header
LB: loop body
LE: loop exit
PB: predicated region body
PF: predicated region fallthrough
CT: control target
= control target key end

     0   :  { %12 = vsyncpa [#allocation5], 0  ;;  %s864_s0 = inlined_call_operand.hbm [shape: f32[2], index: 0, kind: input, shape index: {}]   ;;  %s865_s1 = inlined_call_operand.hbm [shape: f32[16,128], index: 1, kind: input, shape index: {}]   ;;  %s866_s2 = inlined_call_operand.hbm [shape: f32[16,128], index: 2, kind: input, shape index: {}]   ;;  %s867_s3 = inlined_call_operand.hbm [shape: bf16[128,128], index: 3, kind: input, shape index: {}]   ;;  %s868_s4 = inlined_call_operand.hbm [shape: f32[1,128], index: 4, kind: input, shape index: {}]   ;;  %s869_s5 = inlined_call_operand.hbm [shape: bf16[128,128], index: 5, kind: input, shape index: {}]   ;;  %s870_s6 = inlined_call_operand.hbm [shape: f32[1,128], index: 6, kind: input, shape index: {}]   ;;  %s871_s7 = inlined_call_operand.hbm [shape: f32[16,128], index: 7, kind: output, shape index: {}]  }
   0x1   :  { %13 = vsyncpa [#allocation3], 0 }
   0x2   :  { %14 = vsyncpa [#allocation8], 0 }
   0x3   :  { %15 = vsyncpa [#allocation11], 0 }
   0x4   :  { %16 = vsyncpa [#allocation14], 0 }
   0x5   :  { %17 = vsyncpa [#allocation4], 0  ;;  %s693_s24 = smov [#allocation7]   ;;  %s694_s26 = smov [#allocation10]  }
   0x6   :  { %s43_s25 = sshll.u32 %s693_s24, 4  ;;  %s68_s27 = sshll.u32 %s694_s26, 4  ;;  %s44_s25 = int_to_ptr.vmem [resolvable:$true] %s43_s25  ;;  %s747_s27 = int_to_ptr.vmem [resolvable:$true] %s68_s27 }
   0x7   :  { %s517_s30 = scalar_lea.hbm %s866_s2, 256 }
   0x8   :  { %p518_p0 = scmp.ne.s32.totalorder %s866_s2, %s517_s30  ;;  %p521_p1 = scmp.lt.u32.totalorder %s517_s30, %s866_s2 }
   0xa   :  { %p523_p2 = pnand %p521_p1, %p518_p0 }
   0xc   :  { %526 = shalt.err (!%p523_p2)
}
   0xd   :  { %s527_s12 = scalar_lea.vmem %s44_s25, 256  ;;  %p532_p4 = scmp.lt.s32.totalorder %s44_s25, %s44_s25 }
   0xe   :  { %p528_p3 = scmp.ne.s32.totalorder %s44_s25, %s527_s12  ;;  %p533_p5 = scmp.lt.s32.totalorder %s527_s12, %s527_s12 }
  0x10   :  { %p534_p6 = por %p533_p5, %p532_p4 }
  0x12   :  { %p535_p7 = pnand %p534_p6, %p528_p3 }
  0x14   :  { %538 = shalt.err (!%p535_p7)
}
  0x15   :  { %s695_s13 = smov 128   ;;  %s696_s14 = smov 8  }
  0x16   :  { %49 = dma.hbm_to_vmem [thread:$0]  %s866_s2, 256, %s44_s25, [#allocation8], %s695_s13, %s695_s13, %s696_s14  }
  0x17   :  { %s539_s19 = scalar_lea.hbm %s868_s4, 16 }
  0x18   :  { %p540_p8 = scmp.ne.s32.totalorder %s868_s4, %s539_s19  ;;  %p543_p9 = scmp.lt.u32.totalorder %s539_s19, %s868_s4 }
  0x1a   :  { %p545_p10 = pnand %p543_p9, %p540_p8 }
  0x1c   :  { %548 = shalt.err (!%p545_p10)
}
  0x1d   :  { %s549_s24 = scalar_lea.vmem %s747_s27, 16  ;;  %s553_s2 = scalar_lea.vmem %s747_s27, 32 }
  0x1e   :  { %p550_p11 = scmp.ne.s32.totalorder %s747_s27, %s549_s24  ;;  %p554_p12 = scmp.lt.s32.totalorder %s747_s27, %s747_s27 }
  0x1f   :  { %p555_p13 = scmp.lt.s32.totalorder %s553_s2, %s549_s24 }
  0x21   :  { %p556_p0 = por %p555_p13, %p554_p12 }
  0x23   :  { %p557_p1 = pnand %p556_p0, %p550_p11 }
  0x25   :  { %560 = shalt.err (!%p557_p1)
}
  0x26   :  { %71 = dma.hbm_to_vmem [thread:$0]  %s868_s4, 16, %s747_s27, [#allocation11]  }
  0x27   :  { %s561_s30 = scalar_lea.hbm %s864_s0, 16 }
  0x28   :  { %p562_p2 = scmp.ne.s32.totalorder %s864_s0, %s561_s30  ;;  %p565_p3 = scmp.lt.u32.totalorder %s561_s30, %s864_s0 }
  0x2a   :  { %p567_p4 = pnand %p565_p3, %p562_p2 }
  0x2c   :  { %570 = shalt.err (!%p567_p4)
}
  0x2d   :  { %s697_s12 = smov [#allocation2]   ;;  %s698_s4 = smov [#allocation6]  }
  0x2e   :  { %25 = dma.hbm_to_smem %s864_s0, 16, %s697_s12, [#allocation5]  }
  0x2f   :  { %s31_s27 = sshll.u32 %s698_s4, 4  ;;  %s699_s17 = smov [#allocation9]   ;;  %s32_s27 = int_to_ptr.vmem [resolvable:$true] %s31_s27 }
  0x30   :  { %s55_s18 = sshll.u32 %s699_s17, 4  ;;  %s571_s21 = scalar_lea.hbm %s865_s1, 256  ;;  %s56_s18 = int_to_ptr.vmem [resolvable:$true] %s55_s18 }
  0x31   :  { %p572_p5 = scmp.ne.s32.totalorder %s865_s1, %s571_s21  ;;  %p575_p6 = scmp.lt.u32.totalorder %s571_s21, %s865_s1 }
  0x33   :  { %p577_p7 = pnand %p575_p6, %p572_p5 }
  0x35   :  { %580 = shalt.err (!%p577_p7)
}
  0x36   :  { %s581_s0 = scalar_lea.vmem %s32_s27, 256  ;;  %p586_p9 = scmp.lt.s32.totalorder %s32_s27, %s32_s27 }
  0x37   :  { %p582_p8 = scmp.ne.s32.totalorder %s32_s27, %s581_s0  ;;  %p587_p10 = scmp.lt.s32.totalorder %s581_s0, %s581_s0 }
  0x39   :  { %p588_p11 = por %p587_p10, %p586_p9 }
  0x3b   :  { %p589_p12 = pnand %p588_p11, %p582_p8 }
  0x3d   :  { %592 = shalt.err (!%p589_p12)
}
  0x3e   :  { %37 = dma.hbm_to_vmem [thread:$0]  %s865_s1, 256, %s32_s27, [#allocation3], %s695_s13, %s695_s13, %s696_s14  }
  0x3f   :  { %s593_s30 = scalar_lea.hbm %s867_s3, 1024 }
  0x40   :  { %p594_p13 = scmp.ne.s32.totalorder %s867_s3, %s593_s30  ;;  %p597_p0 = scmp.lt.u32.totalorder %s593_s30, %s867_s3 }
  0x42   :  { %p599_p1 = pnand %p597_p0, %p594_p13 }
  0x44   :  { %602 = shalt.err (!%p599_p1)
}
  0x45   :  { %s603_s12 = scalar_lea.vmem %s56_s18, 1024  ;;  %p608_p3 = scmp.lt.s32.totalorder %s56_s18, %s56_s18 }
  0x46   :  { %p604_p2 = scmp.ne.s32.totalorder %s56_s18, %s603_s12  ;;  %p609_p4 = scmp.lt.s32.totalorder %s603_s12, %s603_s12 }
  0x48   :  { %p610_p5 = por %p609_p4, %p608_p3 }
  0x4a   :  { %p611_p6 = pnand %p610_p5, %p604_p2 }
  0x4c   :  { %614 = shalt.err (!%p611_p6)
}
  0x4d   :  { %s700_s1 = smov 64   ;;  %s701_s15 = smov 4  }
  0x4e   :  { %61 = dma.hbm_to_vmem [thread:$0]  %s867_s3, 1024, %s56_s18, [#allocation8], %s700_s1, %s700_s1, %s701_s15  }
  0x4f   :  { %s702_s27 = smov [#allocation12]   ;;  %s703_s19 = smov [#allocation13]  }
  0x50   :  { %s77_s17 = sshll.u32 %s702_s27, 4  ;;  %s90_s20 = sshll.u32 %s703_s19, 4  ;;  %s78_s17 = int_to_ptr.vmem [resolvable:$true] %s77_s17  ;;  %s91_s20 = int_to_ptr.vmem [resolvable:$true] %s90_s20 }
  0x51   :  { %s615_s23 = scalar_lea.hbm %s869_s5, 1024 }
  0x52   :  { %p616_p7 = scmp.ne.s32.totalorder %s869_s5, %s615_s23  ;;  %p619_p8 = scmp.lt.u32.totalorder %s615_s23, %s869_s5 }
  0x54   :  { %p621_p9 = pnand %p619_p8, %p616_p7 }
  0x56   :  { %624 = shalt.err (!%p621_p9)
}
  0x57   :  { %s625_s3 = scalar_lea.vmem %s78_s17, 1024  ;;  %p630_p11 = scmp.lt.s32.totalorder %s78_s17, %s78_s17 }
  0x58   :  { %p626_p10 = scmp.ne.s32.totalorder %s78_s17, %s625_s3  ;;  %p631_p12 = scmp.lt.s32.totalorder %s625_s3, %s625_s3 }
  0x5a   :  { %p632_p13 = por %p631_p12, %p630_p11 }
  0x5c   :  { %p633_p0 = pnand %p632_p13, %p626_p10 }
  0x5e   :  { %636 = shalt.err (!%p633_p0)
}
  0x5f   :  { %83 = dma.hbm_to_vmem [thread:$0]  %s869_s5, 1024, %s78_s17, [#allocation11], %s700_s1, %s700_s1, %s701_s15  }
  0x60   :  { %s637_s30 = scalar_lea.hbm %s870_s6, 16 }
  0x61   :  { %p638_p1 = scmp.ne.s32.totalorder %s870_s6, %s637_s30  ;;  %p641_p2 = scmp.lt.u32.totalorder %s637_s30, %s870_s6 }
  0x63   :  { %p643_p3 = pnand %p641_p2, %p638_p1 }
  0x65   :  { %646 = shalt.err (!%p643_p3)
}
  0x66   :  { %s647_s12 = scalar_lea.vmem %s91_s20, 16  ;;  %s651_s16 = scalar_lea.vmem %s91_s20, 32 }
  0x67   :  { %p648_p4 = scmp.ne.s32.totalorder %s91_s20, %s647_s12  ;;  %p652_p5 = scmp.lt.s32.totalorder %s91_s20, %s91_s20 }
  0x68   :  { %p653_p6 = scmp.lt.s32.totalorder %s651_s16, %s647_s12 }
  0x6a   :  { %p654_p7 = por %p653_p6, %p652_p5 }
  0x6c   :  { %p655_p8 = pnand %p654_p7, %p648_p4 }
  0x6e   :  { %658 = shalt.err (!%p655_p8)
}
  0x6f   :  { %93 = dma.hbm_to_vmem [thread:$0]  %s870_s6, 16, %s91_s20, [#allocation14]  }
  0x70   :  { %681 = dma.done.wait [#allocation5], 16  }
  0x71   :  { %682 = vsyncadd [#allocation5], 4294967280 }
  0x72   :  { %683 = dma.done.wait [#allocation3], 256  }
  0x73   :  { %684 = vsyncadd [#allocation3], 4294967040 }
  0x74   :  { %685 = dma.done.wait [#allocation8], 1280  }
  0x75   :  { %686 = vsyncadd [#allocation8], 4294966016 }
  0x76   :  { %687 = dma.done.wait [#allocation11], 1040  }
  0x77   :  { %688 = vsyncadd [#allocation11], 4294966256 }
  0x78   :  { %689 = dma.done.wait [#allocation14], 16  }
  0x79   :  { %690 = vsyncadd [#allocation14], 4294967280 }
  0x7a   :  { %115 = sfence }
  0x7b   :  { %v493_v0 = vld [vmem:[#allocation9] sm:$0xff]   ;;  %v704_v1 = vmov 0.0   ;;  %v494_v2 = vld [vmem:[#allocation9 + $0x8] sm:$0xff]   ;;  %vm705_vm0 = vmmov 0   ;;  %v495_v3 = vld [vmem:[#allocation9 + $0x10] sm:$0xff]   ;;  %s367_s6 = sld [smem:[#allocation2]] }
  0x7c   :  { %439 = vmatprep.subr.bf16.mxu0 %v704_v1  ;;  %459 = vmatprep.subr.bf16.mxu1 %v704_v1  ;;  %v501_v4 = vld [vmem:[#allocation12] sm:$0xff]   ;;  %v496_v5 = vld [vmem:[#allocation9 + $0x18] sm:$0xff]   ;;  %v502_v6 = vld [vmem:[#allocation12 + $0x8] sm:$0xff]   ;;  %s420_s15 = sld [smem:[#allocation2 + $0x1]]  ;;  %s706_s4 = smov [#allocation15]  }
  0x7d   :  { %440 = vmatpush3.bf16.msra.mxu0 %v493_v0  ;;  %455 = vmatprep.mubr.msk.bf16.mxu0 %vm705_vm0, %v704_v1  ;;  %v497_v7 = vld [vmem:[#allocation9 + $0x20] sm:$0xff]   ;;  %v503_v8 = vld [vmem:[#allocation12 + $0x10] sm:$0xff]   ;;  %v498_v9 = vld [vmem:[#allocation9 + $0x28] sm:$0xff]   ;;  %s386_s27 = sshll.u32 %s706_s4, 4  ;;  %s387_s27 = int_to_ptr.vmem [resolvable:$true] %s386_s27 }
  0x7e   :  { %441 = vmatprep.subr.bf16.mxu0 %v704_v1  ;;  %475 = vmatprep.mubr.msk.bf16.mxu1 %vm705_vm0, %v704_v1  ;;  %v504_v10 = vld [vmem:[#allocation12 + $0x18] sm:$0xff]   ;;  %v499_v11 = vld [vmem:[#allocation9 + $0x30] sm:$0xff]   ;;  %v505_v12 = vld [vmem:[#allocation12 + $0x20] sm:$0xff]   ;;  %s659_s17 = scalar_lea.vmem %s387_s27, 256  ;;  %p664_p10 = scmp.lt.s32.totalorder %s387_s27, %s387_s27 }
  0x7f   :  { %460 = vmatpush3.bf16.msra.mxu1 %v501_v4  ;;  %v500_v13 = vld [vmem:[#allocation9 + $0x38] sm:$0xff]   ;;  %v117_v14 = vld [vmem:[#allocation7] sm:$0xff]  ;;  %v402_v20 = vld [vmem:[#allocation10] ss:$0 sm:$0xff]  ;;  %p660_p9 = scmp.ne.s32.totalorder %s387_s27, %s659_s17  ;;  %p665_p11 = scmp.lt.s32.totalorder %s659_s17, %s659_s17 }
  0x80   :  { %461 = vmatprep.subr.bf16.mxu1 %v704_v1  ;;  %v845_v15 = vld [vmem:[#allocation7 + $0x8] sm:$0xff]  ;;  %v506_v16 = vld [vmem:[#allocation12 + $0x28] sm:$0xff]   ;;  %v411_v30 = vld [vmem:[#allocation13] ss:$0 sm:$0xff] }
  0x81   :  { %442 = vmatpush3.bf16.msra.mxu0 %v494_v2  ;;  %v153_v17 = vpack.c.bf16 %v845_v15, %v117_v14  ;;  %v507_v18 = vld [vmem:[#allocation12 + $0x30] sm:$0xff]   ;;  %v508_v19 = vld [vmem:[#allocation12 + $0x38] sm:$0xff]   ;;  %v370_v49 = vstv %s367_s6  ;;  %v369_v55 = vld [vmem:[#allocation6 + $0x8] sm:$0xff]  ;;  %p666_p12 = por %p665_p11, %p664_p10 }
  0x82   :  { %443 = vmatprep.subr.bf16.mxu0 %v704_v1  ;;  %v368_v48 = vld [vmem:[#allocation6] sm:$0xff]  ;;  %v374_v51 = vstv %s420_s15  ;;  %v372_v59 = vmul.f32 %v370_v49, %v369_v55 }
  0x83   :  { %462 = vmatpush3.bf16.msra.mxu1 %v502_v6  ;;  %v371_v53 = vmul.f32 %v370_v49, %v368_v48  ;;  %p667_p13 = pnand %p666_p12, %p660_p9 }
  0x84   :  { %463 = vmatprep.subr.bf16.mxu1 %v704_v1 }
  0x85   :  { %444 = vmatpush3.bf16.msra.mxu0 %v495_v3 }
  0x86   :  { %445 = vmatprep.subr.bf16.mxu0 %v704_v1 }
  0x87   :  { %464 = vmatpush3.bf16.msra.mxu1 %v503_v8 }
  0x88   :  { %465 = vmatprep.subr.bf16.mxu1 %v704_v1 }
  0x89   :  { %446 = vmatpush3.bf16.msra.mxu0 %v496_v5 }
  0x8a   :  { %447 = vmatprep.subr.bf16.mxu0 %v704_v1 }
  0x8b   :  { %466 = vmatpush3.bf16.msra.mxu1 %v504_v10 }
  0x8c   :  { %467 = vmatprep.subr.bf16.mxu1 %v704_v1 }
  0x8d   :  { %448 = vmatpush3.bf16.msra.mxu0 %v497_v7 }
  0x8e   :  { %449 = vmatprep.subr.bf16.mxu0 %v704_v1 }
  0x8f   :  { %468 = vmatpush3.bf16.msra.mxu1 %v505_v12 }
  0x90   :  { %469 = vmatprep.subr.bf16.mxu1 %v704_v1 }
  0x91   :  { %450 = vmatpush3.bf16.msra.mxu0 %v498_v9 }
  0x92   :  { %451 = vmatprep.subr.bf16.mxu0 %v704_v1 }
  0x93   :  { %470 = vmatpush3.bf16.msra.mxu1 %v506_v16 }
  0x94   :  { %471 = vmatprep.subr.bf16.mxu1 %v704_v1 }
  0x95   :  { %452 = vmatpush3.bf16.msra.mxu0 %v499_v11 }
  0x96   :  { %453 = vmatprep.subr.bf16.mxu0 %v704_v1 }
  0x97   :  { %472 = vmatpush3.bf16.msra.mxu1 %v507_v18 }
  0x98   :  { %473 = vmatprep.subr.bf16.mxu1 %v704_v1 }
  0x99   :  { %454 = vmatpush3.bf16.msra.mxu0 %v500_v13 }
  0x9b   :  { %474 = vmatpush3.bf16.msra.mxu1 %v508_v19 }
  0x9c   :  { %456 = vmatmul.mubr.bf16.vlgmr.msra.gmra.mrb[0].mxu0 %v153_v17 }
 0x16f   :  { %v242_v21 = vpop.f32.mrb[0].mxu0 }
 0x170   :  { %v243_v22 = vadd.f32 %v402_v20, %v242_v21  ;;  %v457_v23 = vpop.f32.mrb[1].mxu0 }
 0x171   :  { %v245_v24 = vpop.f32.mrb[2].mxu0 }
 0x172   :  { %v246_v25 = vadd.f32 %v402_v20, %v245_v24  ;;  %v458_v26 = vpop.f32.mrb[3].mxu0  ;;  %v249_v27 = vmax.f32 %v243_v22, 0.0 }
 0x174   :  { %v250_v28 = vmax.f32 %v246_v25, 0.0 }
 0x176   :  { %v251_v29 = vpack.c.bf16 %v250_v28, %v249_v27 }
 0x178   :  { %476 = vmatmul.mubr.bf16.vlgmr.msra.gmra.mrb[0].mxu1 %v251_v29 }
 0x24b   :  { %v340_v31 = vpop.f32.mrb[0].mxu1 }
 0x24c   :  { %v341_v32 = vadd.f32 %v411_v30, %v340_v31  ;;  %v477_v33 = vpop.f32.mrb[1].mxu1 }
 0x24d   :  { %v343_v34 = vpop.f32.mrb[2].mxu1 }
 0x24e   :  { %347 = vmax.xlane.f32.xlu0 %v341_v32  ;;  %v478_v35 = vpop.f32.mrb[3].mxu1  ;;  %v344_v36 = vadd.f32 %v411_v30, %v343_v34 }
 0x252   :  { %349 = vmax.xlane.f32.xlu0 %v344_v36 }
 0x2db   :  { %v348_v37 = vpop.xlane.xlu0 %347 }
 0x2dc   :  { %v351_v38 = vsub.f32 %v341_v32, %v348_v37 }
 0x2de   :  { %v353_v39 = vmul.f32 1.442695, %v351_v38 }
 0x2df   :  { %v350_v40 = vpop.xlane.xlu0 %349 }
 0x2e0   :  { %509 = vpow2.f32 %v353_v39  ;;  %v352_v41 = vsub.f32 %v344_v36, %v350_v40 }
 0x2e2   :  { %v355_v42 = vmul.f32 1.442695, %v352_v41 }
 0x2e4   :  { %511 = vpow2.f32 %v355_v42 }
 0x2ea   :  { %v510_v43 = vpop.eup %509 }
 0x2eb   :  { %357 = vadd.xlane.f32.xlu1 %v510_v43 }
 0x2ee   :  { %v512_v44 = vpop.eup %511 }
 0x2ef   :  { %359 = vadd.xlane.f32.xlu1 %v512_v44 }
 0x378   :  { %v358_v45 = vpop.xlane.xlu1 %357 }
 0x379   :  { %513 = vrcp.f32 %v358_v45 }
 0x37c   :  { %v360_v46 = vpop.xlane.xlu1 %359 }
 0x37d   :  { %515 = vrcp.f32 %v360_v46 }
 0x383   :  { %v514_v47 = vpop.eup %513 }
 0x384   :  { %v363_v50 = vmul.f32 %v514_v47, %v510_v43 }
 0x386   :  { %v365_v52 = vmul.f32 %v363_v50, %v117_v14 }
 0x387   :  { %v516_v54 = vpop.eup %515 }
 0x388   :  { %v364_v56 = vmul.f32 %v516_v54, %v512_v44  ;;  %v375_v57 = vmul.f32 %v374_v51, %v365_v52 }
 0x38a   :  { %v366_v58 = vmul.f32 %v364_v56, %v845_v15  ;;  %v377_v60 = vadd.f32 %v375_v57, %v371_v53 }
 0x38c   :  { %v376_v61 = vmul.f32 %v374_v51, %v366_v58  ;;  %379 = vst [vmem:[#allocation15] sm:$0xff] %v377_v60 }
 0x38e   :  { %v378_v62 = vadd.f32 %v376_v61, %v372_v59 }
 0x390   :  { %380 = vst [vmem:[#allocation15 + $0x8] sm:$0xff] %v378_v62 }
 0x391   :  { %670 = shalt.err (!%p667_p13)
}
 0x392   :  { %s671_s21 = scalar_lea.hbm %s871_s7, 256 }
 0x393   :  { %p672_p0 = scmp.ne.s32.totalorder %s871_s7, %s671_s21  ;;  %p675_p1 = scmp.lt.u32.totalorder %s671_s21, %s871_s7 }
 0x395   :  { %p677_p2 = pnand %p675_p1, %p672_p0 }
 0x397   :  { %680 = shalt.err (!%p677_p2)
}
 0x398   :  { %392 = dma.vmem_to_hbm [thread:$0]  %s387_s27, 256, %s871_s7, [#allocation4], %s695_s13, %s695_s13, %s696_s14  }
 0x399   :  { %691 = dma.done.wait [#allocation4], 256  }
 0x39a   :  { %692 = vsyncadd [#allocation4], 4294967040 }
 0x39b   :  { %396 = vsyncpa [#allocation3], 1 }
 0x39c   :  { %397 = vsyncpa [#allocation8], 1 }
 0x39d   :  { %398 = vsyncpa [#allocation11], 1 }
 0x39e   :  { %399 = vsyncpa [#allocation14], 1 }
 0x39f   :  { %400 = vsyncpa [#allocation4], 1 }
 0x3a0   :  { %401 = vsyncpa [#allocation5], 1 }

</bundles_post_ra>
